<compile_context>
chip_gen: v5e
topology: v5e:2x2
jax: 0.10.0
libtpu: 0.0.40
codegen_flags: <defaults>
</compile_context>

<pallas_src>
import functools
import math

import jax
import jax.numpy as jnp
from jax import lax
from jax.experimental import pallas as pl
from jax.experimental.pallas import tpu as pltpu


# ----------------------------------------------------------------------------
# Hardware-aware budgets
# ----------------------------------------------------------------------------
def _vmem_capacity_bytes() -> int:
    try:
        return int(pltpu.get_tpu_info().vmem_capacity_bytes)
    except Exception:
        return 64 * 1024 * 1024          # conservative (v7x-sized) fallback


_VMEM_CAP = _vmem_capacity_bytes()
# ~48 MiB on v7x (64 MiB VMEM), ~96 MiB on v5e/v6e (128 MiB VMEM).
_VMEM_LIMIT = min((_VMEM_CAP * 3) // 4, 100 * 1024 * 1024)
_BLOCK_BYTES_BUDGET = _VMEM_LIMIT // 3   # per-step double-buffered blocks

# Run the MXU in bf16 (with f32 accumulation) even for f32 inputs: 3-8x MXU
# rate and half the resident-constant VMEM.  Set False for f32-exact compute.
_PREFER_BF16_MXU = True


def _mxu_dtype(x_dtype):
    if x_dtype == jnp.bfloat16:
        return jnp.bfloat16
    if _PREFER_BF16_MXU and x_dtype == jnp.float32:
        return jnp.bfloat16
    return jnp.float32


def _round_down(v, m):
    return (v // m) * m


def _lcm(a, b):
    return a * b // math.gcd(a, b)


def _const_block_spec(shape, index_map):
    """BlockSpec for grid-invariant operands: single-buffered when supported."""
    try:
        return pl.BlockSpec(shape, index_map, pipeline_mode=pl.Buffered(1))
    except Exception:                      # older jax: no pipeline_mode kwarg
        return pl.BlockSpec(shape, index_map)


def _interp_matrix(n_in: int, n_out: int) -> jnp.ndarray:
    """Dense (n_out, n_in) matrix for 1-D linear interp, align_corners=True."""
    if n_in == 1:
        return jnp.ones((n_out, 1), jnp.float32)
    out_idx = jnp.arange(n_out, dtype=jnp.float32)
    src = out_idx * (n_in - 1) / (n_out - 1)
    lo = jnp.clip(jnp.floor(src).astype(jnp.int32), 0, n_in - 2)
    frac = src - lo.astype(jnp.float32)
    rows = jnp.arange(n_out)
    A = jnp.zeros((n_out, n_in), jnp.float32)
    A = A.at[rows, lo].add(1.0 - frac)
    A = A.at[rows, lo + 1].add(frac)
    return A


# ----------------------------------------------------------------------------
# Bilinear 2x upsample (align_corners=True)
# ----------------------------------------------------------------------------
def _bilinear_kron_kernel(x_ref, k_ref, o_ref):
    # x_ref: (bc, H*W)   k_ref: (H*W, 4*H*W)   o_ref: (bc, 4*H*W)
    o_ref[...] = jnp.dot(x_ref[...].astype(k_ref.dtype), k_ref[...],
                         preferred_element_type=jnp.float32).astype(o_ref.dtype)


@functools.lru_cache(maxsize=None)
def _kron_matrix(H, W, dtype_name):
    Ah = _interp_matrix(H, 2 * H)
    Aw = _interp_matrix(W, 2 * W)
    # Kt[(h,w), (i,j)] = Ah[i,h] * Aw[j,w]  ->  out_flat = x_flat @ Kt
    Kt = jnp.einsum("ih,jw->hwij", Ah, Aw).reshape(H * W, 4 * H * W)
    return jax.device_put(Kt.astype(jnp.dtype(dtype_name)))


def _bilinear_kron(x):
    N, C, H, W = x.shape
    Ho, Wo = 2 * H, 2 * W
    NC, HW, HWo = N * C, H * W, Ho * Wo
    cdt = _mxu_dtype(x.dtype)
    csize = jnp.dtype(cdt).itemsize
    isize = jnp.dtype(x.dtype).itemsize
    sub = 16 if csize == 2 else 8

    Kt = _kron_matrix(H, W, jnp.dtype(cdt).name)

    # planes per grid step (input+output blocks, double-buffered)
    bc = _BLOCK_BYTES_BUDGET // (2 * (HW + HWo) * isize)
    bc = max(1, min(bc, 1024, NC))
    # keep >=2 (>=4 for bigger inputs) grid steps so megacore parts use both TCs
    if NC >= 2 * sub:
        bc = min(bc, pl.cdiv(NC, 2))
    if NC >= 8 * sub:
        bc = min(bc, pl.cdiv(NC, 4))
    if bc > sub:
        bc = _round_down(bc, sub)          # dtype sublane packing granularity

    x2 = x.reshape(NC, HW)                 # free reshape (NCHW row-major)
    flops = 2 * NC * HW * HWo
    bytes_accessed = (NC * HW + NC * HWo) * isize + HW * HWo * csize

    out = pl.pallas_call(
        _bilinear_kron_kernel,
        out_shape=jax.ShapeDtypeStruct((NC, HWo), x.dtype),
        grid=(pl.cdiv(NC, bc),),
        in_specs=[
            pl.BlockSpec((bc, HW), lambda i: (i, 0)),
            _const_block_spec((HW, HWo), lambda i: (0, 0)),
        ],
        out_specs=pl.BlockSpec((bc, HWo), lambda i: (i, 0)),
        compiler_params=pltpu.CompilerParams(
            dimension_semantics=("parallel",),
            vmem_limit_bytes=_VMEM_LIMIT),
        cost_estimate=pl.CostEstimate(flops=flops, transcendentals=0,
                                      bytes_accessed=bytes_accessed),
    )(x2, Kt)
    return out.reshape(N, C, Ho, Wo)


def _bilinear_sep_kernel(x_ref, ah_ref, awt_ref, o_ref, xw_ref):
    # x_ref:  (bc*H, W)     bc planes, rows flattened (no transpose needed)
    # ah_ref: (tr, H)       row-interp tile        awt_ref: (W, 2W)
    # o_ref:  (bc, tr, 2W)  output row-tile        xw_ref:  (bc*H, 2W) scratch
    h_in = ah_ref.shape[1]

    # Stage 1 (width upsample): one batched GEMM over all planes of the block,
    # cached in VMEM and reused for every output-row tile (recomputed at j==0).
    @pl.when(pl.program_id(1) == 0)
    def _():
        xw_ref[...] = jnp.dot(
            x_ref[...].astype(awt_ref.dtype), awt_ref[...],
            preferred_element_type=jnp.float32).astype(xw_ref.dtype)

    # Stage 2 (height upsample) per plane.
    for b in range(o_ref.shape[0]):
        o_ref[b] = jnp.dot(
            ah_ref[...], xw_ref[pl.ds(b * h_in, h_in), :],
            preferred_element_type=jnp.float32).astype(o_ref.dtype)


@functools.lru_cache(maxsize=None)
def _sep_matrices(H, W, dtype_name):
    dt = jnp.dtype(dtype_name)
    Ah = _interp_matrix(H, 2 * H).astype(dt)        # (2H, H)
    Awt = _interp_matrix(W, 2 * W).T.astype(dt)     # (W, 2W)
    return jax.device_put(Ah), jax.device_put(Awt)


def _bilinear_separable(x):
    N, C, H, W = x.shape
    Ho, Wo = 2 * H, 2 * W
    NC = N * C
    cdt = _mxu_dtype(x.dtype)
    csize = jnp.dtype(cdt).itemsize
    isize = jnp.dtype(x.dtype).itemsize

    Ah, Awt = _sep_matrices(H, W, jnp.dtype(cdt).name)

    tr = Ho if Ho <= 256 else 256                    # output-row tile
    per_plane = 2 * H * W * isize + H * Wo * csize + 2 * tr * Wo * isize
    bc = max(1, min(8, _BLOCK_BYTES_BUDGET // max(per_plane, 1), NC))
    if NC >= 2:
        bc = min(bc, pl.cdiv(NC, 2))                 # >=2 plane steps (megacore)

    xr = x.reshape(NC * H, W)                        # free reshape
    flops = 2 * NC * (H * W * Wo + Ho * H * Wo)
    bytes_accessed = (NC * H * W + NC * Ho * Wo) * isize

    out = pl.pallas_call(
        _bilinear_sep_kernel,
        out_shape=jax.ShapeDtypeStruct((NC, Ho, Wo), x.dtype),
        grid=(pl.cdiv(NC, bc), pl.cdiv(Ho, tr)),
        in_specs=[
            pl.BlockSpec((bc * H, W), lambda i, j: (i, 0)),
            pl.BlockSpec((tr, H), lambda i, j: (j, 0)),
            _const_block_spec((W, Wo), lambda i, j: (0, 0)),
        ],
        out_specs=pl.BlockSpec((bc, tr, Wo), lambda i, j: (i, j, 0)),
        scratch_shapes=[pltpu.VMEM((bc * H, Wo), cdt)],
        compiler_params=pltpu.CompilerParams(
            dimension_semantics=("parallel", "arbitrary"),
            vmem_limit_bytes=_VMEM_LIMIT),
        cost_estimate=pl.CostEstimate(flops=flops, transcendentals=0,
                                      bytes_accessed=bytes_accessed),
    )(xr, Ah, Awt)
    return out.reshape(N, C, Ho, Wo)


def _bilinear_upsample_2x(x):
    """x: (N, C, H, W) -> (N, C, 2H, 2W), mode='bilinear', align_corners=True."""
    _, _, H, W = x.shape
    cdt = _mxu_dtype(x.dtype)
    csize = jnp.dtype(cdt).itemsize
    # Dense-Kron GEMM only while it stays memory/overhead bound (tighter cutoff
    # for f32 compute, e.g. v5e without the bf16 cast) and the (HW, 4HW) matrix
    # is a small resident constant; otherwise use the separable form.
    kron_max_hw = 512 if csize == 2 else 192
    if H * W <= kron_max_hw and 4 * H * W * H * W * csize <= _BLOCK_BYTES_BUDGET:
        return _bilinear_kron(x)
    return _bilinear_separable(x)


bilinear_upsample_2x = jax.jit(_bilinear_upsample_2x)


# ----------------------------------------------------------------------------
# ConvTranspose2d(C, C // 2, kernel_size=2, stride=2) with fused interleave
# ----------------------------------------------------------------------------
def _convt_kernel(x_ref, w_ref, b_ref, o_ref):
    # x_ref: (1, C, tr*W)  input rows, flattened spatial (lane dense)
    # w_ref: (4*Cout, C)   rows ordered (kw, kh, co)     b_ref: (4*Cout, 1)
    # o_ref: (1, Cout, 2*tr, 2W)  NCHW output tile, pixel-interleaved in-kernel
    cout = o_ref.shape[1]
    two_w = o_ref.shape[3]
    w_in = two_w // 2
    tr = o_ref.shape[2] // 2

    # 0/1 column-scatter matrices (even / odd output columns), built on-chip.
    col = lax.broadcasted_iota(jnp.int32, (w_in, two_w), 1)
    row = lax.broadcasted_iota(jnp.int32, (w_in, two_w), 0)
    e0 = (col == 2 * row).astype(jnp.float32)
    e1 = (col == 2 * row + 1).astype(jnp.float32)

    x = x_ref[0].astype(w_ref.dtype)
    z = jnp.dot(w_ref[...], x, preferred_element_type=jnp.float32) + b_ref[...]

    for r in range(tr):                               # static unroll over rows
        zr = z[:, r * w_in:(r + 1) * w_in]            # (4*Cout, W)
        u = zr[:2 * cout]                             # kw = 0, rows (kh, co)
        v = zr[2 * cout:]                             # kw = 1, rows (kh, co)
        rows = (jnp.dot(u, e0, preferred_element_type=jnp.float32) +
                jnp.dot(v, e1, preferred_element_type=jnp.float32))   # (2Cout, 2W)
        o_ref[0, :, 2 * r, :] = rows[:cout].astype(o_ref.dtype)       # kh = 0
        o_ref[0, :, 2 * r + 1, :] = rows[cout:].astype(o_ref.dtype)   # kh = 1


def _conv_transpose_2x(x, w2, b4):
    """x: (N, C, H, W); w2: (4*Cout, C) rows (kw, kh, co); b4: (4*Cout, 1)."""
    N, C, H, W = x.shape
    Cout = w2.shape[0] // 4
    HW = H * W
    isize = jnp.dtype(x.dtype).itemsize

    # Row tile: whole input rows.  tr*W must be a multiple of 128 (or the full
    # plane) for lane-dense blocks, and 2*tr a multiple of 8 for the output.
    lane_step = 128 // math.gcd(W, 128)
    step = _lcm(4, lane_step)
    per_row = 2 * C * W * isize + 8 * Cout * W * isize + 16 * Cout * W
    tr_cap = min(H, 64, max(1, _BLOCK_BYTES_BUDGET // max(per_row, 1)))
    tr = _round_down(tr_cap, step)
    if tr == 0:
        tr = min(H, step)
    if tr >= H:
        tr = H                                        # full plane (always legal)
    if N == 1 and tr == H and H >= 2 * step:
        tr = max(step, _round_down(H // 2, step))     # >=2 steps for megacore

    flops = 2 * N * (4 * Cout) * C * HW + 2 * N * (2 * Cout) * (2 * H) * W * (2 * W)
    bytes_accessed = (N * C * HW + 4 * N * Cout * HW) * isize

    out = pl.pallas_call(
        _convt_kernel,
        out_shape=jax.ShapeDtypeStruct((N, Cout, 2 * H, 2 * W), x.dtype),
        grid=(N, pl.cdiv(H, tr)),
        in_specs=[
            pl.BlockSpec((1, C, tr * W), lambda n, j: (n, 0, j)),
            _const_block_spec((4 * Cout, C), lambda n, j: (0, 0)),
            _const_block_spec((4 * Cout, 1), lambda n, j: (0, 0)),
        ],
        out_specs=pl.BlockSpec((1, Cout, 2 * tr, 2 * W), lambda n, j: (n, 0, j, 0)),
        compiler_params=pltpu.CompilerParams(
            dimension_semantics=("parallel", "parallel"),
            vmem_limit_bytes=_VMEM_LIMIT),
        cost_estimate=pl.CostEstimate(flops=flops, transcendentals=0,
                                      bytes_accessed=bytes_accessed),
    )(x.reshape(N, C, HW), w2, b4)
    return out


conv_transpose_2x = jax.jit(_conv_transpose_2x)


# ----------------------------------------------------------------------------
# Module wrapper
# ----------------------------------------------------------------------------
class UpTranspose:
    """JAX/Pallas port of the PyTorch UpTranspose module (forward only)."""

    def __init__(self, in_channels: int, bilinear: bool = True, key=None):
        self.bilinear = bilinear
        self.in_channels = in_channels
        if not bilinear:
            if key is None:
                key = jax.random.PRNGKey(0)
            kw_, kb_ = jax.random.split(key)
            out_ch = in_channels // 2
            fan_in = in_channels * 2 * 2
            bound = 1.0 / (fan_in ** 0.5)
            self.weight = jax.random.uniform(
                kw_, (in_channels, out_ch, 2, 2), jnp.float32, -bound, bound)
            self.bias = jax.random.uniform(
                kb_, (out_ch,), jnp.float32, -bound, bound)
            # Precompute kernel-side constants once: rows ordered (kw, kh, co)
            # so the in-kernel pixel interleave is plain row slicing.
            cdt = _mxu_dtype(self.weight.dtype)
            self.w2 = jnp.transpose(self.weight, (3, 2, 1, 0)) \
                         .reshape(4 * out_ch, in_channels).astype(cdt)
            self.b4 = jnp.tile(self.bias.astype(jnp.float32), 4)[:, None]

    def __call__(self, x):
        if self.bilinear:
            return bilinear_upsample_2x(x)
        return conv_transpose_2x(x, self.w2, self.b4)


if __name__ == "__main__":
    key = jax.random.PRNGKey(0)
    kx, kx2, kp = jax.random.split(key, 3)
    tol = dict(atol=5e-2, rtol=5e-2) if _PREFER_BF16_MXU else dict(atol=1e-4, rtol=1e-4)

    # bilinear (default) path, dense-Kron branch: (2,4,16,16) -> (2,4,32,32)
    x = jax.random.normal(kx, (2, 4, 16, 16), jnp.float32)
    up_bilinear = UpTranspose(in_channels=4, bilinear=True)
    y_bi = jax.block_until_ready(up_bilinear(x))
    assert y_bi.shape == (2, 4, 32, 32)
    ref_bi = jnp.einsum("rh,nchw,sw->ncrs",
                        _interp_matrix(16, 32), x, _interp_matrix(16, 32))
    assert jnp.allclose(y_bi, ref_bi, **tol)

    # bilinear path, separable branch (larger plane): (2,3,40,32) -> (2,3,80,64)
    xb = jax.random.normal(kx2, (2, 3, 40, 32), jnp.float32)
    y_sep = jax.block_until_ready(bilinear_upsample_2x(xb))
    assert y_sep.shape == (2, 3, 80, 64)
    ref_sep = jnp.einsum("rh,nchw,sw->ncrs",
                         _interp_matrix(40, 80), xb, _interp_matrix(32, 64))
    assert jnp.allclose(y_sep, ref_sep, **tol)

    # ConvTranspose2d path: (2,4,16,16) -> (2,2,32,32)
    up_convt = UpTranspose(in_channels=4, bilinear=False, key=kp)
    y_ct = jax.block_until_ready(up_convt(x))
    assert y_ct.shape == (2, 2, 32, 32)
    ref6 = jnp.einsum("nchw,cokl->nohkwl", x, up_convt.weight)
    ref_ct = ref6.reshape(2, 2, 32, 32) + up_convt.bias[None, :, None, None]
    assert jnp.allclose(y_ct, ref_ct, **tol)

    print("KERNEL_OK")
</pallas_src>

<mosaic_0001>
module attributes {stable_mosaic.version = 11 : i64} {
  func.func @_bilinear_kron_kernel(%arg0: i32, %arg1: memref<8x256xf32, #tpu.memory_space<vmem>>, %arg2: memref<256x1024xbf16, #tpu.memory_space<vmem>>, %arg3: memref<8x1024xf32, #tpu.memory_space<vmem>>) attributes {dimension_semantics = [#tpu.dimension_semantics<parallel>], iteration_bounds = array<i64: 1>, scalar_prefetch = 0 : i64, scratch_operands = 0 : i64, tpu.core_type = #tpu.core_type<tc>, window_params = [{transform_indices = @transform_0, window_bounds = array<i64: 8, 256>}, {pipeline_mode = #tpu.pipeline_mode<synchronous>, transform_indices = @transform_1, window_bounds = array<i64: 256, 1024>}, {transform_indices = @transform_2, window_bounds = array<i64: 8, 1024>}]} {
    %c0 = arith.constant 0 : index
    %c0_0 = arith.constant 0 : index
    %0 = vector.load %arg1[%c0, %c0_0] : memref<8x256xf32, #tpu.memory_space<vmem>>, vector<8x256xf32>
    %1 = arith.truncf %0 : vector<8x256xf32> to vector<8x256xbf16>
    %c0_1 = arith.constant 0 : index
    %c0_2 = arith.constant 0 : index
    %2 = vector.load %arg2[%c0_1, %c0_2] : memref<256x1024xbf16, #tpu.memory_space<vmem>>, vector<256x1024xbf16>
    %cst = arith.constant dense<0.000000e+00> : vector<8x1024xf32>
    %3 = tpu.matmul %1, %2, %cst {dimension_numbers = #tpu.dot_dimension_numbers<[1], [0], [0], [1], [0, 0, 1, 1], [], []>} : vector<8x256xbf16>, vector<256x1024xbf16>, vector<8x1024xf32> -> vector<8x1024xf32>
    %c0_3 = arith.constant 0 : index
    %c0_4 = arith.constant 0 : index
    %4 = vector.load %arg3[%c0_3, %c0_4] : memref<8x1024xf32, #tpu.memory_space<vmem>>, vector<8x1024xf32>
    tpu.vector_store %arg3[%c0_3, %c0_4], %3 {strides = array<i32>} : memref<8x1024xf32, #tpu.memory_space<vmem>>, vector<8x1024xf32>,
    return
  }
  func.func @transform_0(%arg0: i32) -> (i32, i32) {
    %c0_i32 = arith.constant 0 : i32
    %c0_i32_0 = arith.constant 0 : i32
    return %arg0, %c0_i32 : i32, i32
  }
  func.func @transform_1(%arg0: i32) -> (i32, i32) {
    %c0_i32 = arith.constant 0 : i32
    %c0_i32_0 = arith.constant 0 : i32
    %c0_i32_1 = arith.constant 0 : i32
    return %c0_i32, %c0_i32_0 : i32, i32
  }
  func.func @transform_2(%arg0: i32) -> (i32, i32) {
    %c0_i32 = arith.constant 0 : i32
    %c0_i32_0 = arith.constant 0 : i32
    return %arg0, %c0_i32 : i32, i32
  }
}

</mosaic_0001>

<bundles_post_ra>
// kernel: _bilinear_upsample_2x.1
= control target key start
LH: loop header
LB: loop body
LE: loop exit
PB: predicated region body
PF: predicated region fallthrough
CT: control target
= control target key end

     0   :  { %s2476_s1 = inlined_call_operand.vmem [shape: bf16[256,1024], index: 1, kind: input, shape index: {}]   ;;  %s2477_s0 = inlined_call_operand.vmem [shape: f32[8,256], index: 0, kind: input, shape index: {}]   ;;  %s2478_s2 = inlined_call_operand.vmem [shape: f32[8,1024], index: 2, kind: output, shape index: {}]  }
   0x1   :  { %v1229_v0 = vld [vmem:[%s2476_s1 + $0x1c0] sm:$0xf]  ;;  %v1571_v5 = vld [vmem:[%s2476_s1 + $0x1c4] sm:$0xf] }
   0x2   :  { %v1575_v1 = vld [vmem:[%s2476_s1 + $0x1dc] sm:$0xf0]  ;;  %v1231_v6 = vld [vmem:[%s2476_s1 + $0x1e0] sm:$0xf0] }
   0x3   :  { %v1485_v2 = vld [vmem:[%s2476_s1 + $0x3c0] sm:$0xf]  ;;  %v1230_v3 = vor.u32 %v1575_v1, %v1229_v0  ;;  %v1234_v8 = vor.u32 %v1571_v5, %v1231_v6  ;;  %v1635_v9 = vld [vmem:[%s2476_s1 + $0x3c4] sm:$0xf] }
   0x4   :  { %v1639_v4 = vld [vmem:[%s2476_s1 + $0x3dc] sm:$0xf0]  ;;  %v1487_v10 = vld [vmem:[%s2476_s1 + $0x3e0] sm:$0xf0] }
   0x5   :  { %v1486_v7 = vor.u32 %v1639_v4, %v1485_v2  ;;  %v1197_v11 = vld [vmem:[%s2476_s1 + $0x180] sm:$0xf]  ;;  %783 = vmatpush.bf16.msra.mxu0 %v1230_v3  ;;  %v1490_v12 = vor.u32 %v1635_v9, %v1487_v10  ;;  %809 = vmatpush.bf16.msra.mxu2 %v1234_v8  ;;  %v1563_v18 = vld [vmem:[%s2476_s1 + $0x184] sm:$0xf] }
   0x6   :  { %v1567_v13 = vld [vmem:[%s2476_s1 + $0x19c] sm:$0xf0]  ;;  %v1199_v19 = vld [vmem:[%s2476_s1 + $0x1a0] sm:$0xf0] }
   0x7   :  { %v1453_v14 = vld [vmem:[%s2476_s1 + $0x380] sm:$0xf]  ;;  %796 = vmatpush.bf16.msra.mxu1 %v1486_v7  ;;  %v1198_v16 = vor.u32 %v1567_v13, %v1197_v11  ;;  %v1627_v20 = vld [vmem:[%s2476_s1 + $0x384] sm:$0xf]  ;;  %822 = vmatpush.bf16.msra.mxu3 %v1490_v12  ;;  %v1202_v21 = vor.u32 %v1563_v18, %v1199_v19 }
   0x8   :  { %v1631_v15 = vld [vmem:[%s2476_s1 + $0x39c] sm:$0xf0]  ;;  %v1455_v22 = vld [vmem:[%s2476_s1 + $0x3a0] sm:$0xf0] }
   0x9   :  { %v1454_v17 = vor.u32 %v1631_v15, %v1453_v14  ;;  %v1165_v23 = vld [vmem:[%s2476_s1 + $0x140] sm:$0xf]  ;;  %v1458_v25 = vor.u32 %v1627_v20, %v1455_v22  ;;  %v1555_v28 = vld [vmem:[%s2476_s1 + $0x144] sm:$0xf]  ;;  %784 = vmatpush.bf16.msra.mxu0 %v1198_v16  ;;  %810 = vmatpush.bf16.msra.mxu2 %v1202_v21 }
   0xa   :  { %v1559_v24 = vld [vmem:[%s2476_s1 + $0x15c] sm:$0xf0]  ;;  %v1167_v30 = vld [vmem:[%s2476_s1 + $0x160] sm:$0xf0] }
   0xb   :  { %v1421_v26 = vld [vmem:[%s2476_s1 + $0x340] sm:$0xf]  ;;  %v1166_v29 = vor.u32 %v1559_v24, %v1165_v23  ;;  %v1619_v31 = vld [vmem:[%s2476_s1 + $0x344] sm:$0xf]  ;;  %797 = vmatpush.bf16.msra.mxu1 %v1454_v17  ;;  %v1170_v34 = vor.u32 %v1555_v28, %v1167_v30  ;;  %823 = vmatpush.bf16.msra.mxu3 %v1458_v25  ;;  %v1237_v28 = vld [vmem:[%s2476_s1 + $0x1c8] sm:$0xf] }
   0xc   :  { %v1623_v27 = vld [vmem:[%s2476_s1 + $0x35c] sm:$0xf0]  ;;  %v1423_v32 = vld [vmem:[%s2476_s1 + $0x360] sm:$0xf0]  ;;  %v1493_v30 = vld [vmem:[%s2476_s1 + $0x3c8] sm:$0xf] }
   0xd   :  { %v1422_v33 = vor.u32 %v1623_v27, %v1421_v26  ;;  %v1133_v35 = vld [vmem:[%s2476_s1 + $0x100] sm:$0xf]  ;;  %v1426_v38 = vor.u32 %v1619_v31, %v1423_v32  ;;  %v1547_v40 = vld [vmem:[%s2476_s1 + $0x104] sm:$0xf]  ;;  %785 = vmatpush.bf16.msra.mxu0 %v1166_v29  ;;  %811 = vmatpush.bf16.msra.mxu2 %v1170_v34  ;;  %v1576_v29 = vld [vmem:[%s2476_s1 + $0x1e4] sm:$0xf0] }
   0xe   :  { %v1551_v36 = vld [vmem:[%s2476_s1 + $0x11c] sm:$0xf0]  ;;  %v1135_v41 = vld [vmem:[%s2476_s1 + $0x120] sm:$0xf0]  ;;  %v1640_v32 = vld [vmem:[%s2476_s1 + $0x3e4] sm:$0xf0] }
   0xf   :  { %v1389_v37 = vld [vmem:[%s2476_s1 + $0x300] sm:$0xf]  ;;  %v1611_v42 = vld [vmem:[%s2476_s1 + $0x304] sm:$0xf]  ;;  %v1134_v44 = vor.u32 %v1551_v36, %v1133_v35  ;;  %798 = vmatpush.bf16.msra.mxu1 %v1422_v33  ;;  %v1138_v46 = vor.u32 %v1547_v40, %v1135_v41  ;;  %824 = vmatpush.bf16.msra.mxu3 %v1426_v38  ;;  %v1572_v33 = vld [vmem:[%s2476_s1 + $0x1cc] sm:$0xf]  ;;  %v1238_v40 = vor.u32 %v1576_v29, %v1237_v28 }
  0x10   :  { %v1615_v39 = vld [vmem:[%s2476_s1 + $0x31c] sm:$0xf0]  ;;  %v1391_v43 = vld [vmem:[%s2476_s1 + $0x320] sm:$0xf0]  ;;  %v1239_v34 = vld [vmem:[%s2476_s1 + $0x1e8] sm:$0xf0]  ;;  %v1494_v41 = vor.u32 %v1640_v32, %v1493_v30 }
  0x11   :  { %v1390_v45 = vor.u32 %v1615_v39, %v1389_v37  ;;  %v1101_v47 = vld [vmem:[%s2476_s1 + $0xc0] sm:$0xf]  ;;  %v1394_v50 = vor.u32 %v1611_v42, %v1391_v43  ;;  %v1539_v52 = vld [vmem:[%s2476_s1 + $0xc4] sm:$0xf]  ;;  %786 = vmatpush.bf16.msra.mxu0 %v1134_v44  ;;  %812 = vmatpush.bf16.msra.mxu2 %v1138_v46  ;;  %v1636_v37 = vld [vmem:[%s2476_s1 + $0x3cc] sm:$0xf]  ;;  %v1242_v42 = vor.u32 %v1572_v33, %v1239_v34 }
  0x12   :  { %v1543_v48 = vld [vmem:[%s2476_s1 + $0xdc] sm:$0xf0]  ;;  %v1103_v53 = vld [vmem:[%s2476_s1 + $0xe0] sm:$0xf0]  ;;  %v1495_v38 = vld [vmem:[%s2476_s1 + $0x3e8] sm:$0xf0] }
  0x13   :  { %v1357_v49 = vld [vmem:[%s2476_s1 + $0x2c0] sm:$0xf]  ;;  %v1603_v54 = vld [vmem:[%s2476_s1 + $0x2c4] sm:$0xf]  ;;  %v1102_v56 = vor.u32 %v1543_v48, %v1101_v47  ;;  %799 = vmatpush.bf16.msra.mxu1 %v1390_v45  ;;  %v1106_v58 = vor.u32 %v1539_v52, %v1103_v53  ;;  %825 = vmatpush.bf16.msra.mxu3 %v1394_v50  ;;  %v1205_v43 = vld [vmem:[%s2476_s1 + $0x188] sm:$0xf]  ;;  %v1498_v46 = vor.u32 %v1636_v37, %v1495_v38 }
  0x14   :  { %v1607_v51 = vld [vmem:[%s2476_s1 + $0x2dc] sm:$0xf0]  ;;  %v1359_v55 = vld [vmem:[%s2476_s1 + $0x2e0] sm:$0xf0]  ;;  %v1568_v44 = vld [vmem:[%s2476_s1 + $0x1a4] sm:$0xf0] }
  0x15   :  { %v1358_v57 = vor.u32 %v1607_v51, %v1357_v49  ;;  %v1069_v59 = vld [vmem:[%s2476_s1 + $0x80] sm:$0xf]  ;;  %v1362_v62 = vor.u32 %v1603_v54, %v1359_v55  ;;  %v1531_v0 = vld [vmem:[%s2476_s1 + $0x84] sm:$0xf]  ;;  %787 = vmatpush.bf16.msra.mxu0 %v1102_v56  ;;  %813 = vmatpush.bf16.msra.mxu2 %v1106_v58  ;;  %v1461_v45 = vld [vmem:[%s2476_s1 + $0x388] sm:$0xf]  ;;  %v1206_v52 = vor.u32 %v1568_v44, %v1205_v43 }
  0x16   :  { %v1535_v60 = vld [vmem:[%s2476_s1 + $0x9c] sm:$0xf0]  ;;  %v1071_v1 = vld [vmem:[%s2476_s1 + $0xa0] sm:$0xf0]  ;;  %v1632_v47 = vld [vmem:[%s2476_s1 + $0x3a4] sm:$0xf0] }
  0x17   :  { %v1325_v61 = vld [vmem:[%s2476_s1 + $0x280] sm:$0xf]  ;;  %v1595_v2 = vld [vmem:[%s2476_s1 + $0x284] sm:$0xf]  ;;  %v1070_v4 = vor.u32 %v1535_v60, %v1069_v59  ;;  %800 = vmatpush.bf16.msra.mxu1 %v1358_v57  ;;  %v1074_v6 = vor.u32 %v1531_v0, %v1071_v1  ;;  %826 = vmatpush.bf16.msra.mxu3 %v1362_v62  ;;  %v1564_v48 = vld [vmem:[%s2476_s1 + $0x18c] sm:$0xf]  ;;  %v1462_v54 = vor.u32 %v1632_v47, %v1461_v45 }
  0x18   :  { %v1599_v63 = vld [vmem:[%s2476_s1 + $0x29c] sm:$0xf0]  ;;  %v1327_v3 = vld [vmem:[%s2476_s1 + $0x2a0] sm:$0xf0]  ;;  %v1207_v49 = vld [vmem:[%s2476_s1 + $0x1a8] sm:$0xf0] }
  0x19   :  { %v1326_v5 = vor.u32 %v1599_v63, %v1325_v61  ;;  %v1037_v7 = vld [vmem:[%s2476_s1 + $0x40] sm:$0xf]  ;;  %v1330_v10 = vor.u32 %v1595_v2, %v1327_v3  ;;  %v1523_v12 = vld [vmem:[%s2476_s1 + $0x44] sm:$0xf]  ;;  %788 = vmatpush.bf16.msra.mxu0 %v1070_v4  ;;  %814 = vmatpush.bf16.msra.mxu2 %v1074_v6  ;;  %v1628_v50 = vld [vmem:[%s2476_s1 + $0x38c] sm:$0xf]  ;;  %v1210_v55 = vor.u32 %v1564_v48, %v1207_v49 }
  0x1a   :  { %v1527_v8 = vld [vmem:[%s2476_s1 + $0x5c] sm:$0xf0]  ;;  %v1039_v13 = vld [vmem:[%s2476_s1 + $0x60] sm:$0xf0]  ;;  %v1463_v51 = vld [vmem:[%s2476_s1 + $0x3a8] sm:$0xf0] }
  0x1b   :  { %v1293_v9 = vld [vmem:[%s2476_s1 + $0x240] sm:$0xf]  ;;  %v1587_v14 = vld [vmem:[%s2476_s1 + $0x244] sm:$0xf]  ;;  %v1038_v16 = vor.u32 %v1527_v8, %v1037_v7  ;;  %801 = vmatpush.bf16.msra.mxu1 %v1326_v5  ;;  %v1042_v20 = vor.u32 %v1523_v12, %v1039_v13  ;;  %827 = vmatpush.bf16.msra.mxu3 %v1330_v10  ;;  %v1173_v53 = vld [vmem:[%s2476_s1 + $0x148] sm:$0xf]  ;;  %v1466_v59 = vor.u32 %v1628_v50, %v1463_v51 }
  0x1c   :  { %v1591_v11 = vld [vmem:[%s2476_s1 + $0x25c] sm:$0xf0]  ;;  %v1295_v15 = vld [vmem:[%s2476_s1 + $0x260] sm:$0xf0]  ;;  %v1560_v56 = vld [vmem:[%s2476_s1 + $0x164] sm:$0xf0] }
  0x1d   :  { %v1005_v17 = vld [vmem:[%s2476_s1] sm:$0xf]  ;;  %v1294_v19 = vor.u32 %v1591_v11, %v1293_v9  ;;  %v1515_v23 = vld [vmem:[%s2476_s1 + $0x4] sm:$0xf]  ;;  %v1298_v24 = vor.u32 %v1587_v14, %v1295_v15  ;;  %789 = vmatpush.bf16.msra.mxu0 %v1038_v16  ;;  %815 = vmatpush.bf16.msra.mxu2 %v1042_v20  ;;  %v1429_v57 = vld [vmem:[%s2476_s1 + $0x348] sm:$0xf]  ;;  %v1174_v0 = vor.u32 %v1560_v56, %v1173_v53 }
  0x1e   :  { %v1519_v18 = vld [vmem:[%s2476_s1 + $0x1c] sm:$0xf0]  ;;  %v1007_v25 = vld [vmem:[%s2476_s1 + $0x20] sm:$0xf0]  ;;  %v1624_v58 = vld [vmem:[%s2476_s1 + $0x364] sm:$0xf0] }
  0x1f   :  { %v1261_v21 = vld [vmem:[%s2476_s1 + $0x200] sm:$0xf]  ;;  %v1579_v26 = vld [vmem:[%s2476_s1 + $0x204] sm:$0xf]  ;;  %v1006_v31 = vor.u32 %v1519_v18, %v1005_v17  ;;  %802 = vmatpush.bf16.msra.mxu1 %v1294_v19  ;;  %v1010_v36 = vor.u32 %v1515_v23, %v1007_v25  ;;  %828 = vmatpush.bf16.msra.mxu3 %v1298_v24  ;;  %v1556_v60 = vld [vmem:[%s2476_s1 + $0x14c] sm:$0xf]  ;;  %v1430_v1 = vor.u32 %v1624_v58, %v1429_v57 }
  0x20   :  { %v1583_v22 = vld [vmem:[%s2476_s1 + $0x21c] sm:$0xf0]  ;;  %v1263_v27 = vld [vmem:[%s2476_s1 + $0x220] sm:$0xf0]  ;;  %v1175_v61 = vld [vmem:[%s2476_s1 + $0x168] sm:$0xf0] }
  0x21   :  { %v1262_v35 = vor.u32 %v1583_v22, %v1261_v21  ;;  %v1266_v39 = vor.u32 %v1579_v26, %v1263_v27  ;;  %790 = vmatpush.bf16.msra.mxu0 %v1006_v31  ;;  %816 = vmatpush.bf16.msra.mxu2 %v1010_v36  ;;  %v1620_v62 = vld [vmem:[%s2476_s1 + $0x34c] sm:$0xf]  ;;  %v11_v2 = vld [vmem:[%s2477_s0] sm:$0xff]  ;;  %v1178_v4 = vor.u32 %v1556_v60, %v1175_v61  ;;  %v1141_v5 = vld [vmem:[%s2476_s1 + $0x108] sm:$0xf] }
  0x22   :  { %v1431_v63 = vld [vmem:[%s2476_s1 + $0x368] sm:$0xf0]  ;;  %v1552_v6 = vld [vmem:[%s2476_s1 + $0x124] sm:$0xf0]  ;;  %v1937_v8 = vpack.c.bf16 %v11_v2, %v11_v2  ;;  %v1501_v2 = vld [vmem:[%s2476_s1 + $0x3d0] sm:$0xf] }
  0x23   :  { %803 = vmatpush.bf16.msra.mxu1 %v1262_v35  ;;  %829 = vmatpush.bf16.msra.mxu3 %v1266_v39  ;;  %v12_v3 = vld [vmem:[%s2477_s0 + $0x8] sm:$0xff]  ;;  %v1434_v10 = vor.u32 %v1620_v62, %v1431_v63  ;;  %v1142_v16 = vor.u32 %v1552_v6, %v1141_v5  ;;  %v1573_v5 = vld [vmem:[%s2476_s1 + $0x1d4] sm:$0xf] }
  0x24   :  { %v1397_v7 = vld [vmem:[%s2476_s1 + $0x308] sm:$0xf]  ;;  %v1939_v9 = vpack.c.bf16 %v12_v3, %v12_v3  ;;  %v1548_v12 = vld [vmem:[%s2476_s1 + $0x10c] sm:$0xf]  ;;  %817 = vmatmul.bf16.vlgmr.msra.gmra.mxu2 %v1937_v8  ;;  %791 = vmatmul.bf16.vlgmr.msra.gmra.mxu0 %v1937_v8  ;;  %v1247_v6 = vld [vmem:[%s2476_s1 + $0x1f0] sm:$0xf0] }
  0x25   :  { %835 = vmatpush.bf16.msrb.mxu0 %v1238_v40  ;;  %861 = vmatpush.bf16.msrb.mxu2 %v1242_v42  ;;  %v1616_v11 = vld [vmem:[%s2476_s1 + $0x324] sm:$0xf0]  ;;  %v1143_v13 = vld [vmem:[%s2476_s1 + $0x128] sm:$0xf0] }
  0x26   :  { %v1612_v14 = vld [vmem:[%s2476_s1 + $0x30c] sm:$0xf]  ;;  %830 = vmatmul.bf16.vlgmr.msra.gmra.mxu3 %v1939_v9  ;;  %804 = vmatmul.bf16.vlgmr.msra.gmra.mxu1 %v1939_v9  ;;  %v1398_v17 = vor.u32 %v1616_v11, %v1397_v7  ;;  %v1146_v18 = vor.u32 %v1548_v12, %v1143_v13  ;;  %v1109_v19 = vld [vmem:[%s2476_s1 + $0xc8] sm:$0xf]  ;;  %v1637_v11 = vld [vmem:[%s2476_s1 + $0x3d4] sm:$0xf] }
  0x27   :  { %848 = vmatpush.bf16.msrb.mxu1 %v1494_v41  ;;  %874 = vmatpush.bf16.msrb.mxu3 %v1498_v46  ;;  %v1399_v15 = vld [vmem:[%s2476_s1 + $0x328] sm:$0xf0]  ;;  %v1544_v20 = vld [vmem:[%s2476_s1 + $0xe4] sm:$0xf0]  ;;  %v1503_v12 = vld [vmem:[%s2476_s1 + $0x3f0] sm:$0xf0] }
  0x28   :  { %v1365_v21 = vld [vmem:[%s2476_s1 + $0x2c8] sm:$0xf]  ;;  %v1402_v22 = vor.u32 %v1612_v14, %v1399_v15  ;;  %v1540_v24 = vld [vmem:[%s2476_s1 + $0xcc] sm:$0xf]  ;;  %v1110_v28 = vor.u32 %v1544_v20, %v1109_v19  ;;  %v1469_v19 = vld [vmem:[%s2476_s1 + $0x390] sm:$0xf]  ;;  %v1506_v20 = vor.u32 %v1637_v11, %v1503_v12 }
  0x29   :  { %836 = vmatpush.bf16.msrb.mxu0 %v1206_v52  ;;  %862 = vmatpush.bf16.msrb.mxu2 %v1210_v55  ;;  %v1608_v23 = vld [vmem:[%s2476_s1 + $0x2e4] sm:$0xf0]  ;;  %v1111_v25 = vld [vmem:[%s2476_s1 + $0xe8] sm:$0xf0]  ;;  %v1343_v11 = vld [vmem:[%s2476_s1 + $0x2b0] sm:$0xf0] }
  0x2a   :  { %v1604_v26 = vld [vmem:[%s2476_s1 + $0x2cc] sm:$0xf]  ;;  %v1366_v29 = vor.u32 %v1608_v23, %v1365_v21  ;;  %v1114_v30 = vor.u32 %v1540_v24, %v1111_v25  ;;  %v1077_v31 = vld [vmem:[%s2476_s1 + $0x88] sm:$0xf]  ;;  %v1633_v21 = vld [vmem:[%s2476_s1 + $0x3ac] sm:$0xf0] }
  0x2b   :  { %849 = vmatpush.bf16.msrb.mxu1 %v1462_v54  ;;  %875 = vmatpush.bf16.msrb.mxu3 %v1466_v59  ;;  %v1367_v27 = vld [vmem:[%s2476_s1 + $0x2e8] sm:$0xf0]  ;;  %v1536_v32 = vld [vmem:[%s2476_s1 + $0xa4] sm:$0xf0]  ;;  %v1215_v23 = vld [vmem:[%s2476_s1 + $0x1b0] sm:$0xf0] }
  0x2c   :  { %v1333_v33 = vld [vmem:[%s2476_s1 + $0x288] sm:$0xf]  ;;  %v1370_v34 = vor.u32 %v1604_v26, %v1367_v27  ;;  %v1532_v36 = vld [vmem:[%s2476_s1 + $0x8c] sm:$0xf]  ;;  %v1078_v40 = vor.u32 %v1536_v32, %v1077_v31  ;;  %v1629_v24 = vld [vmem:[%s2476_s1 + $0x394] sm:$0xf]  ;;  %v1470_v27 = vor.u32 %v1633_v21, %v1469_v19 }
  0x2d   :  { %837 = vmatpush.bf16.msrb.mxu0 %v1174_v0  ;;  %863 = vmatpush.bf16.msrb.mxu2 %v1178_v4  ;;  %v1600_v35 = vld [vmem:[%s2476_s1 + $0x2a4] sm:$0xf0]  ;;  %v1079_v37 = vld [vmem:[%s2476_s1 + $0xa8] sm:$0xf0]  ;;  %v1245_v0 = vld [vmem:[%s2476_s1 + $0x1d0] sm:$0xf] }
  0x2e   :  { %v1596_v38 = vld [vmem:[%s2476_s1 + $0x28c] sm:$0xf]  ;;  %v1334_v41 = vor.u32 %v1600_v35, %v1333_v33  ;;  %v1082_v42 = vor.u32 %v1532_v36, %v1079_v37  ;;  %v1045_v43 = vld [vmem:[%s2476_s1 + $0x48] sm:$0xf]  ;;  %v1641_v4 = vld [vmem:[%s2476_s1 + $0x3ec] sm:$0xf0] }
  0x2f   :  { %850 = vmatpush.bf16.msrb.mxu1 %v1430_v1  ;;  %876 = vmatpush.bf16.msrb.mxu3 %v1434_v10  ;;  %v1335_v39 = vld [vmem:[%s2476_s1 + $0x2a8] sm:$0xf0]  ;;  %v1528_v44 = vld [vmem:[%s2476_s1 + $0x64] sm:$0xf0]  ;;  %v1577_v1 = vld [vmem:[%s2476_s1 + $0x1ec] sm:$0xf0]  ;;  %v1502_v15 = vor.u32 %v1641_v4, %v1501_v2 }
  0x30   :  { %v1301_v45 = vld [vmem:[%s2476_s1 + $0x248] sm:$0xf]  ;;  %v1338_v46 = vor.u32 %v1596_v38, %v1335_v39  ;;  %v1524_v48 = vld [vmem:[%s2476_s1 + $0x4c] sm:$0xf]  ;;  %v1046_v52 = vor.u32 %v1528_v44, %v1045_v43  ;;  %v1246_v14 = vor.u32 %v1577_v1, %v1245_v0  ;;  %v1471_v25 = vld [vmem:[%s2476_s1 + $0x3b0] sm:$0xf0] }
  0x31   :  { %838 = vmatpush.bf16.msrb.mxu0 %v1142_v16  ;;  %864 = vmatpush.bf16.msrb.mxu2 %v1146_v18  ;;  %v1592_v47 = vld [vmem:[%s2476_s1 + $0x264] sm:$0xf0]  ;;  %v1047_v49 = vld [vmem:[%s2476_s1 + $0x68] sm:$0xf0]  ;;  %v1250_v16 = vor.u32 %v1573_v5, %v1247_v6  ;;  %v1569_v18 = vld [vmem:[%s2476_s1 + $0x1ac] sm:$0xf0]  ;;  %v1474_v32 = vor.u32 %v1629_v24, %v1471_v25 }
  0x32   :  { %v1588_v50 = vld [vmem:[%s2476_s1 + $0x24c] sm:$0xf]  ;;  %v1013_v53 = vld [vmem:[%s2476_s1 + $0x8] sm:$0xf]  ;;  %v1302_v55 = vor.u32 %v1592_v47, %v1301_v45  ;;  %v1050_v56 = vor.u32 %v1524_v48, %v1047_v49  ;;  %v1437_v31 = vld [vmem:[%s2476_s1 + $0x350] sm:$0xf] }
  0x33   :  { %851 = vmatpush.bf16.msrb.mxu1 %v1398_v17  ;;  %877 = vmatpush.bf16.msrb.mxu3 %v1402_v22  ;;  %v1303_v51 = vld [vmem:[%s2476_s1 + $0x268] sm:$0xf0]  ;;  %v1520_v54 = vld [vmem:[%s2476_s1 + $0x24] sm:$0xf0]  ;;  %v1213_v17 = vld [vmem:[%s2476_s1 + $0x190] sm:$0xf] }
  0x34   :  { %v1269_v57 = vld [vmem:[%s2476_s1 + $0x208] sm:$0xf]  ;;  %v1516_v59 = vld [vmem:[%s2476_s1 + $0xc] sm:$0xf]  ;;  %v1306_v60 = vor.u32 %v1588_v50, %v1303_v51  ;;  %v1014_v3 = vor.u32 %v1520_v54, %v1013_v53  ;;  %v1565_v22 = vld [vmem:[%s2476_s1 + $0x194] sm:$0xf]  ;;  %v1214_v26 = vor.u32 %v1569_v18, %v1213_v17 }
  0x35   :  { %839 = vmatpush.bf16.msrb.mxu0 %v1110_v28  ;;  %865 = vmatpush.bf16.msrb.mxu2 %v1114_v30  ;;  %v1584_v58 = vld [vmem:[%s2476_s1 + $0x224] sm:$0xf0]  ;;  %v1015_v61 = vld [vmem:[%s2476_s1 + $0x28] sm:$0xf0]  ;;  %v1218_v28 = vor.u32 %v1565_v22, %v1215_v23  ;;  %v1561_v30 = vld [vmem:[%s2476_s1 + $0x16c] sm:$0xf0] }
  0x36   :  { %v1580_v62 = vld [vmem:[%s2476_s1 + $0x20c] sm:$0xf]  ;;  %v1270_v7 = vor.u32 %v1584_v58, %v1269_v57  ;;  %v1018_v10 = vor.u32 %v1516_v59, %v1015_v61  ;;  %v1625_v33 = vld [vmem:[%s2476_s1 + $0x36c] sm:$0xf0]  ;;  %v1183_v35 = vld [vmem:[%s2476_s1 + $0x170] sm:$0xf0] }
  0x37   :  { %852 = vmatpush.bf16.msrb.mxu1 %v1366_v29  ;;  %878 = vmatpush.bf16.msrb.mxu3 %v1370_v34  ;;  %v1271_v63 = vld [vmem:[%s2476_s1 + $0x228] sm:$0xf0]  ;;  %v1181_v29 = vld [vmem:[%s2476_s1 + $0x150] sm:$0xf]  ;;  %v1557_v34 = vld [vmem:[%s2476_s1 + $0x154] sm:$0xf]  ;;  %v1438_v39 = vor.u32 %v1625_v33, %v1437_v31 }
  0x38   :  { %v1274_v13 = vor.u32 %v1580_v62, %v1271_v63  ;;  %v1621_v36 = vld [vmem:[%s2476_s1 + $0x354] sm:$0xf]  ;;  %v1182_v38 = vor.u32 %v1561_v30, %v1181_v29  ;;  %v1405_v43 = vld [vmem:[%s2476_s1 + $0x310] sm:$0xf] }
  0x39   :  { %840 = vmatpush.bf16.msrb.mxu0 %v1078_v40  ;;  %866 = vmatpush.bf16.msrb.mxu2 %v1082_v42  ;;  %v1439_v37 = vld [vmem:[%s2476_s1 + $0x370] sm:$0xf0]  ;;  %v1186_v40 = vor.u32 %v1557_v34, %v1183_v35  ;;  %v1553_v42 = vld [vmem:[%s2476_s1 + $0x12c] sm:$0xf0] }
  0x3a   :  { %v1442_v44 = vor.u32 %v1621_v36, %v1439_v37  ;;  %v1617_v45 = vld [vmem:[%s2476_s1 + $0x32c] sm:$0xf0]  ;;  %v1151_v47 = vld [vmem:[%s2476_s1 + $0x130] sm:$0xf0]  ;;  %v1253_v36 = vld [vmem:[%s2476_s1 + $0x1d8] sm:$0xf] }
  0x3b   :  { %853 = vmatpush.bf16.msrb.mxu1 %v1334_v41  ;;  %879 = vmatpush.bf16.msrb.mxu3 %v1338_v46  ;;  %v1149_v41 = vld [vmem:[%s2476_s1 + $0x110] sm:$0xf]  ;;  %v1549_v46 = vld [vmem:[%s2476_s1 + $0x114] sm:$0xf]  ;;  %v1406_v51 = vor.u32 %v1617_v45, %v1405_v43  ;;  %v1578_v37 = vld [vmem:[%s2476_s1 + $0x1f4] sm:$0xf0] }
  0x3c   :  { %v1613_v48 = vld [vmem:[%s2476_s1 + $0x314] sm:$0xf]  ;;  %v1150_v50 = vor.u32 %v1553_v42, %v1149_v41  ;;  %v1117_v53 = vld [vmem:[%s2476_s1 + $0xd0] sm:$0xf]  ;;  %v1574_v41 = vld [vmem:[%s2476_s1 + $0x1dc] sm:$0xf] }
  0x3d   :  { %841 = vmatpush.bf16.msrb.mxu0 %v1046_v52  ;;  %867 = vmatpush.bf16.msrb.mxu2 %v1050_v56  ;;  %v1407_v49 = vld [vmem:[%s2476_s1 + $0x330] sm:$0xf0]  ;;  %v1154_v52 = vor.u32 %v1549_v46, %v1151_v47  ;;  %v1545_v54 = vld [vmem:[%s2476_s1 + $0xec] sm:$0xf0]  ;;  %v1255_v42 = vld [vmem:[%s2476_s1 + $0x1f8] sm:$0xf0] }
  0x3e   :  { %v1410_v56 = vor.u32 %v1613_v48, %v1407_v49  ;;  %v1609_v57 = vld [vmem:[%s2476_s1 + $0x2ec] sm:$0xf0]  ;;  %v1541_v58 = vld [vmem:[%s2476_s1 + $0xd4] sm:$0xf]  ;;  %v1118_v62 = vor.u32 %v1545_v54, %v1117_v53  ;;  %v1638_v45 = vld [vmem:[%s2476_s1 + $0x3dc] sm:$0xf]  ;;  %v1254_v48 = vor.u32 %v1578_v37, %v1253_v36 }
  0x3f   :  { %854 = vmatpush.bf16.msrb.mxu1 %v1302_v55  ;;  %880 = vmatpush.bf16.msrb.mxu3 %v1306_v60  ;;  %v1373_v55 = vld [vmem:[%s2476_s1 + $0x2d0] sm:$0xf]  ;;  %v1119_v59 = vld [vmem:[%s2476_s1 + $0xf0] sm:$0xf0]  ;;  %v1511_v46 = vld [vmem:[%s2476_s1 + $0x3f8] sm:$0xf0] }
  0x40   :  { %v1605_v60 = vld [vmem:[%s2476_s1 + $0x2d4] sm:$0xf]  ;;  %v1374_v63 = vor.u32 %v1609_v57, %v1373_v55  ;;  %v1122_v0 = vor.u32 %v1541_v58, %v1119_v59  ;;  %v1085_v1 = vld [vmem:[%s2476_s1 + $0x90] sm:$0xf]  ;;  %v1477_v53 = vld [vmem:[%s2476_s1 + $0x398] sm:$0xf]  ;;  %v1514_v54 = vor.u32 %v1638_v45, %v1511_v46 }
  0x41   :  { %842 = vmatpush.bf16.msrb.mxu0 %v1014_v3  ;;  %868 = vmatpush.bf16.msrb.mxu2 %v1018_v10  ;;  %v1375_v61 = vld [vmem:[%s2476_s1 + $0x2f0] sm:$0xf0]  ;;  %v1537_v2 = vld [vmem:[%s2476_s1 + $0xac] sm:$0xf0]  ;;  %v1634_v55 = vld [vmem:[%s2476_s1 + $0x3b4] sm:$0xf0] }
  0x42   :  { %v1341_v3 = vld [vmem:[%s2476_s1 + $0x290] sm:$0xf]  ;;  %v1378_v4 = vor.u32 %v1605_v60, %v1375_v61  ;;  %v1533_v6 = vld [vmem:[%s2476_s1 + $0x94] sm:$0xf]  ;;  %v1086_v12 = vor.u32 %v1537_v2, %v1085_v1  ;;  %v1223_v57 = vld [vmem:[%s2476_s1 + $0x1b8] sm:$0xf0]  ;;  %v1478_v61 = vor.u32 %v1634_v55, %v1477_v53 }
  0x43   :  { %855 = vmatpush.bf16.msrb.mxu1 %v1270_v7  ;;  %881 = vmatpush.bf16.msrb.mxu3 %v1274_v13  ;;  %v1601_v5 = vld [vmem:[%s2476_s1 + $0x2ac] sm:$0xf0]  ;;  %v1087_v7 = vld [vmem:[%s2476_s1 + $0xb0] sm:$0xf0]  ;;  %v1630_v58 = vld [vmem:[%s2476_s1 + $0x39c] sm:$0xf] }
  0x44   :  { %869 = vmatmul.bf16.vlgmr.msrb.gmra.mxu2 %v1937_v8  ;;  %843 = vmatmul.bf16.vlgmr.msrb.gmra.mxu0 %v1937_v8  ;;  %v1597_v10 = vld [vmem:[%s2476_s1 + $0x294] sm:$0xf]  ;;  %v1342_v13 = vor.u32 %v1601_v5, %v1341_v3  ;;  %v1309_v17 = vld [vmem:[%s2476_s1 + $0x250] sm:$0xf]  ;;  %v1479_v59 = vld [vmem:[%s2476_s1 + $0x3b8] sm:$0xf0] }
  0x45   :  { %887 = vmatpush.bf16.msra.mxu0 %v1246_v14  ;;  %913 = vmatpush.bf16.msra.mxu2 %v1250_v16  ;;  %v1090_v14 = vor.u32 %v1533_v6, %v1087_v7  ;;  %v1529_v16 = vld [vmem:[%s2476_s1 + $0x6c] sm:$0xf0]  ;;  %v1346_v18 = vor.u32 %v1597_v10, %v1343_v11  ;;  %v1055_v21 = vld [vmem:[%s2476_s1 + $0x70] sm:$0xf0]  ;;  %v1445_v1 = vld [vmem:[%s2476_s1 + $0x358] sm:$0xf]  ;;  %v1482_v2 = vor.u32 %v1630_v58, %v1479_v59 }
  0x46   :  { %882 = vmatmul.bf16.vlgmr.msrb.gmra.mxu3 %v1939_v9  ;;  %856 = vmatmul.bf16.vlgmr.msrb.gmra.mxu1 %v1939_v9  ;;  %v1593_v19 = vld [vmem:[%s2476_s1 + $0x26c] sm:$0xf0]  ;;  %v1589_v22 = vld [vmem:[%s2476_s1 + $0x254] sm:$0xf]  ;;  %v1626_v3 = vld [vmem:[%s2476_s1 + $0x374] sm:$0xf0] }
  0x47   :  { %900 = vmatpush.bf16.msra.mxu1 %v1502_v15  ;;  %926 = vmatpush.bf16.msra.mxu3 %v1506_v20  ;;  %v1053_v15 = vld [vmem:[%s2476_s1 + $0x50] sm:$0xf]  ;;  %v1525_v20 = vld [vmem:[%s2476_s1 + $0x54] sm:$0xf]  ;;  %v1191_v5 = vld [vmem:[%s2476_s1 + $0x178] sm:$0xf0]  ;;  %v1446_v11 = vor.u32 %v1626_v3, %v1445_v1 }
  0x48   :  { %v1311_v23 = vld [vmem:[%s2476_s1 + $0x270] sm:$0xf0]  ;;  %v1054_v24 = vor.u32 %v1529_v16, %v1053_v15  ;;  %v1021_v25 = vld [vmem:[%s2476_s1 + $0x10] sm:$0xf]  ;;  %v1622_v6 = vld [vmem:[%s2476_s1 + $0x35c] sm:$0xf] }
  0x49   :  { %888 = vmatpush.bf16.msra.mxu0 %v1214_v26  ;;  %914 = vmatpush.bf16.msra.mxu2 %v1218_v28  ;;  %v1521_v26 = vld [vmem:[%s2476_s1 + $0x2c] sm:$0xf0]  ;;  %v1058_v28 = vor.u32 %v1525_v20, %v1055_v21  ;;  %v1517_v31 = vld [vmem:[%s2476_s1 + $0x14] sm:$0xf]  ;;  %v1447_v7 = vld [vmem:[%s2476_s1 + $0x378] sm:$0xf0] }
  0x4a   :  { %v1277_v29 = vld [vmem:[%s2476_s1 + $0x210] sm:$0xf]  ;;  %v1023_v33 = vld [vmem:[%s2476_s1 + $0x30] sm:$0xf0]  ;;  %v1413_v15 = vld [vmem:[%s2476_s1 + $0x318] sm:$0xf]  ;;  %v1450_v16 = vor.u32 %v1622_v6, %v1447_v7 }
  0x4b   :  { %901 = vmatpush.bf16.msra.mxu1 %v1470_v27  ;;  %927 = vmatpush.bf16.msra.mxu3 %v1474_v32  ;;  %v1310_v27 = vor.u32 %v1593_v19, %v1309_v17  ;;  %v1585_v30 = vld [vmem:[%s2476_s1 + $0x22c] sm:$0xf0]  ;;  %v1314_v32 = vor.u32 %v1589_v22, %v1311_v23  ;;  %v1581_v34 = vld [vmem:[%s2476_s1 + $0x214] sm:$0xf]  ;;  %v1618_v17 = vld [vmem:[%s2476_s1 + $0x334] sm:$0xf0] }
  0x4c   :  { %v1279_v35 = vld [vmem:[%s2476_s1 + $0x230] sm:$0xf0]  ;;  %v1278_v43 = vor.u32 %v1585_v30, %v1277_v29  ;;  %v1159_v19 = vld [vmem:[%s2476_s1 + $0x138] sm:$0xf0]  ;;  %v1414_v23 = vor.u32 %v1618_v17, %v1413_v15  ;;  %v1610_v29 = vld [vmem:[%s2476_s1 + $0x2f4] sm:$0xf0] }
  0x4d   :  { %889 = vmatpush.bf16.msra.mxu0 %v1182_v38  ;;  %915 = vmatpush.bf16.msra.mxu2 %v1186_v40  ;;  %v1509_v38 = vld [vmem:[%s2476_s1 + $0x3d8] sm:$0xf]  ;;  %v1282_v47 = vor.u32 %v1581_v34, %v1279_v35  ;;  %v1614_v20 = vld [vmem:[%s2476_s1 + $0x31c] sm:$0xf] }
  0x4e   :  { %v1642_v40 = vld [vmem:[%s2476_s1 + $0x3f4] sm:$0xf0]  ;;  %v1415_v21 = vld [vmem:[%s2476_s1 + $0x338] sm:$0xf0] }
  0x4f   :  { %902 = vmatpush.bf16.msra.mxu1 %v1438_v39  ;;  %928 = vmatpush.bf16.msra.mxu3 %v1442_v44  ;;  %v1022_v39 = vor.u32 %v1521_v26, %v1021_v25  ;;  %v1026_v44 = vor.u32 %v1517_v31, %v1023_v33  ;;  %v1510_v49 = vor.u32 %v1642_v40, %v1509_v38  ;;  %v1125_v25 = vld [vmem:[%s2476_s1 + $0xd8] sm:$0xf]  ;;  %v1542_v30 = vld [vmem:[%s2476_s1 + $0xdc] sm:$0xf] }
  0x50   :  { %v1546_v26 = vld [vmem:[%s2476_s1 + $0xf4] sm:$0xf0]  ;;  %v1127_v31 = vld [vmem:[%s2476_s1 + $0xf8] sm:$0xf0] }
  0x51   :  { %890 = vmatpush.bf16.msra.mxu0 %v1150_v50  ;;  %916 = vmatpush.bf16.msra.mxu2 %v1154_v52  ;;  %v1258_v50 = vor.u32 %v1574_v41, %v1255_v42  ;;  %v1570_v52 = vld [vmem:[%s2476_s1 + $0x1b4] sm:$0xf0]  ;;  %v1383_v33 = vld [vmem:[%s2476_s1 + $0x2f8] sm:$0xf0]  ;;  %v1126_v34 = vor.u32 %v1546_v26, %v1125_v25  ;;  %v1130_v36 = vor.u32 %v1542_v30, %v1127_v31 }
  0x52   :  { %v1093_v37 = vld [vmem:[%s2476_s1 + $0x98] sm:$0xf]  ;;  %v1534_v42 = vld [vmem:[%s2476_s1 + $0x9c] sm:$0xf] }
  0x53   :  { %903 = vmatpush.bf16.msra.mxu1 %v1406_v51  ;;  %929 = vmatpush.bf16.msra.mxu3 %v1410_v56  ;;  %v1221_v51 = vld [vmem:[%s2476_s1 + $0x198] sm:$0xf]  ;;  %v1566_v56 = vld [vmem:[%s2476_s1 + $0x19c] sm:$0xf] }
  0x54   :  { %v1222_v60 = vor.u32 %v1570_v52, %v1221_v51  ;;  %v1538_v38 = vld [vmem:[%s2476_s1 + $0xb4] sm:$0xf0]  ;;  %v1351_v45 = vld [vmem:[%s2476_s1 + $0x2b8] sm:$0xf0] }
  0x55   :  { %891 = vmatpush.bf16.msra.mxu0 %v1118_v62  ;;  %917 = vmatpush.bf16.msra.mxu2 %v1122_v0  ;;  %v1226_v62 = vor.u32 %v1566_v56, %v1223_v57  ;;  %v1562_v0 = vld [vmem:[%s2476_s1 + $0x174] sm:$0xf0]  ;;  %v1094_v46 = vor.u32 %v1538_v38, %v1093_v37  ;;  %v1063_v55 = vld [vmem:[%s2476_s1 + $0x78] sm:$0xf0] }
  0x56   :  { %v1602_v41 = vld [vmem:[%s2476_s1 + $0x2b4] sm:$0xf0]  ;;  %v1590_v56 = vld [vmem:[%s2476_s1 + $0x25c] sm:$0xf] }
  0x57   :  { %904 = vmatpush.bf16.msra.mxu1 %v1374_v63  ;;  %930 = vmatpush.bf16.msra.mxu3 %v1378_v4  ;;  %v1189_v63 = vld [vmem:[%s2476_s1 + $0x158] sm:$0xf]  ;;  %v1558_v4 = vld [vmem:[%s2476_s1 + $0x15c] sm:$0xf] }
  0x58   :  { %v1190_v10 = vor.u32 %v1562_v0, %v1189_v63  ;;  %v1317_v51 = vld [vmem:[%s2476_s1 + $0x258] sm:$0xf]  ;;  %v1319_v57 = vld [vmem:[%s2476_s1 + $0x278] sm:$0xf0] }
  0x59   :  { %892 = vmatpush.bf16.msra.mxu0 %v1086_v12  ;;  %918 = vmatpush.bf16.msra.mxu2 %v1090_v14  ;;  %v1194_v12 = vor.u32 %v1558_v4, %v1191_v5  ;;  %v1554_v14 = vld [vmem:[%s2476_s1 + $0x134] sm:$0xf0]  ;;  %v1322_v0 = vor.u32 %v1590_v56, %v1319_v57  ;;  %v1031_v3 = vld [vmem:[%s2476_s1 + $0x38] sm:$0xf0] }
  0x5a   :  { %v1594_v53 = vld [vmem:[%s2476_s1 + $0x274] sm:$0xf0]  ;;  %v1582_v4 = vld [vmem:[%s2476_s1 + $0x21c] sm:$0xf] }
  0x5b   :  { %905 = vmatpush.bf16.msra.mxu1 %v1342_v13  ;;  %931 = vmatpush.bf16.msra.mxu3 %v1346_v18  ;;  %v1157_v13 = vld [vmem:[%s2476_s1 + $0x118] sm:$0xf]  ;;  %v1550_v18 = vld [vmem:[%s2476_s1 + $0x11c] sm:$0xf]  ;;  %v1318_v59 = vor.u32 %v1594_v53, %v1317_v51 }
  0x5c   :  { %v1158_v22 = vor.u32 %v1554_v14, %v1157_v13  ;;  %v1285_v63 = vld [vmem:[%s2476_s1 + $0x218] sm:$0xf]  ;;  %v1287_v5 = vld [vmem:[%s2476_s1 + $0x238] sm:$0xf0] }
  0x5d   :  { %893 = vmatpush.bf16.msra.mxu0 %v1054_v24  ;;  %919 = vmatpush.bf16.msra.mxu2 %v1058_v28  ;;  %v1162_v24 = vor.u32 %v1550_v18, %v1159_v19  ;;  %v1418_v28 = vor.u32 %v1614_v20, %v1415_v21  ;;  %v1586_v1 = vld [vmem:[%s2476_s1 + $0x234] sm:$0xf0] }
  0x5e   :  { %v1286_v7 = vor.u32 %v1586_v1, %v1285_v63 }
  0x5f   :  { %906 = vmatpush.bf16.msra.mxu1 %v1310_v27  ;;  %932 = vmatpush.bf16.msra.mxu3 %v1314_v32  ;;  %v1381_v27 = vld [vmem:[%s2476_s1 + $0x2d8] sm:$0xf]  ;;  %v1606_v32 = vld [vmem:[%s2476_s1 + $0x2dc] sm:$0xf] }
  0x60   :  { %v1382_v35 = vor.u32 %v1610_v29, %v1381_v27  ;;  %v1386_v40 = vor.u32 %v1606_v32, %v1383_v33 }
  0x61   :  { %894 = vmatpush.bf16.msra.mxu0 %v1022_v39  ;;  %920 = vmatpush.bf16.msra.mxu2 %v1026_v44  ;;  %v1349_v39 = vld [vmem:[%s2476_s1 + $0x298] sm:$0xf]  ;;  %v1598_v44 = vld [vmem:[%s2476_s1 + $0x29c] sm:$0xf] }
  0x62   :  { %v1354_v52 = vor.u32 %v1598_v44, %v1351_v45 }
  0x63   :  { %907 = vmatpush.bf16.msra.mxu1 %v1278_v43  ;;  %933 = vmatpush.bf16.msra.mxu3 %v1282_v47  ;;  %v1095_v43 = vld [vmem:[%s2476_s1 + $0xb8] sm:$0xf0]  ;;  %v1350_v47 = vor.u32 %v1602_v41, %v1349_v39 }
  0x64   :  { %921 = vmatmul.bf16.vlgmr.msra.gmra.mxu2 %v1937_v8  ;;  %895 = vmatmul.bf16.vlgmr.msra.gmra.mxu0 %v1937_v8 }
  0x65   :  { %939 = vmatpush.bf16.msrb.mxu0 %v1254_v48  ;;  %965 = vmatpush.bf16.msrb.mxu2 %v1258_v50  ;;  %v1098_v48 = vor.u32 %v1534_v42, %v1095_v43  ;;  %v1530_v50 = vld [vmem:[%s2476_s1 + $0x74] sm:$0xf0] }
  0x66   :  { %934 = vmatmul.bf16.vlgmr.msra.gmra.mxu3 %v1939_v9  ;;  %908 = vmatmul.bf16.vlgmr.msra.gmra.mxu1 %v1939_v9 }
  0x67   :  { %952 = vmatpush.bf16.msrb.mxu1 %v1510_v49  ;;  %978 = vmatpush.bf16.msrb.mxu3 %v1514_v54  ;;  %v1061_v49 = vld [vmem:[%s2476_s1 + $0x58] sm:$0xf]  ;;  %v1526_v54 = vld [vmem:[%s2476_s1 + $0x5c] sm:$0xf] }
  0x68   :  { %v1062_v58 = vor.u32 %v1530_v50, %v1061_v49 }
  0x69   :  { %940 = vmatpush.bf16.msrb.mxu0 %v1222_v60  ;;  %966 = vmatpush.bf16.msrb.mxu2 %v1226_v62  ;;  %v1066_v60 = vor.u32 %v1526_v54, %v1063_v55  ;;  %v1522_v62 = vld [vmem:[%s2476_s1 + $0x34] sm:$0xf0] }
  0x6b   :  { %953 = vmatpush.bf16.msrb.mxu1 %v1478_v61  ;;  %979 = vmatpush.bf16.msrb.mxu3 %v1482_v2  ;;  %v1029_v61 = vld [vmem:[%s2476_s1 + $0x18] sm:$0xf]  ;;  %v1518_v2 = vld [vmem:[%s2476_s1 + $0x1c] sm:$0xf] }
  0x6c   :  { %v1030_v6 = vor.u32 %v1522_v62, %v1029_v61 }
  0x6d   :  { %941 = vmatpush.bf16.msrb.mxu0 %v1190_v10  ;;  %967 = vmatpush.bf16.msrb.mxu2 %v1194_v12  ;;  %v1034_v10 = vor.u32 %v1518_v2, %v1031_v3 }
  0x6f   :  { %954 = vmatpush.bf16.msrb.mxu1 %v1446_v11  ;;  %980 = vmatpush.bf16.msrb.mxu3 %v1450_v16  ;;  %v1290_v11 = vor.u32 %v1582_v4, %v1287_v5 }
  0x71   :  { %942 = vmatpush.bf16.msrb.mxu0 %v1158_v22  ;;  %968 = vmatpush.bf16.msrb.mxu2 %v1162_v24 }
  0x73   :  { %955 = vmatpush.bf16.msrb.mxu1 %v1414_v23  ;;  %981 = vmatpush.bf16.msrb.mxu3 %v1418_v28 }
  0x75   :  { %943 = vmatpush.bf16.msrb.mxu0 %v1126_v34  ;;  %969 = vmatpush.bf16.msrb.mxu2 %v1130_v36 }
  0x77   :  { %956 = vmatpush.bf16.msrb.mxu1 %v1382_v35  ;;  %982 = vmatpush.bf16.msrb.mxu3 %v1386_v40 }
  0x79   :  { %944 = vmatpush.bf16.msrb.mxu0 %v1094_v46  ;;  %970 = vmatpush.bf16.msrb.mxu2 %v1098_v48 }
  0x7b   :  { %957 = vmatpush.bf16.msrb.mxu1 %v1350_v47  ;;  %983 = vmatpush.bf16.msrb.mxu3 %v1354_v52 }
  0x7d   :  { %945 = vmatpush.bf16.msrb.mxu0 %v1062_v58  ;;  %971 = vmatpush.bf16.msrb.mxu2 %v1066_v60 }
  0x7f   :  { %958 = vmatpush.bf16.msrb.mxu1 %v1318_v59  ;;  %984 = vmatpush.bf16.msrb.mxu3 %v1322_v0 }
  0x81   :  { %946 = vmatpush.bf16.msrb.mxu0 %v1030_v6  ;;  %972 = vmatpush.bf16.msrb.mxu2 %v1034_v10 }
  0x83   :  { %959 = vmatpush.bf16.msrb.mxu1 %v1286_v7  ;;  %985 = vmatpush.bf16.msrb.mxu3 %v1290_v11 }
  0x84   :  { %947 = vmatmul.bf16.vlgmr.msrb.gmra.mxu0 %v1937_v8  ;;  %973 = vmatmul.bf16.vlgmr.msrb.gmra.mxu2 %v1937_v8 }
  0x86   :  { %960 = vmatmul.bf16.vlgmr.msrb.gmra.mxu1 %v1939_v9  ;;  %986 = vmatmul.bf16.vlgmr.msrb.gmra.mxu3 %v1939_v9 }
  0xa1   :  { %v792_v13 = vpop.f32.mrf.mxu0 }
  0xa3   :  { %v805_v12 = vpop.f32.mrf.mxu1 }
  0xa4   :  { %v806_v14 = vadd.f32 %v805_v12, %v792_v13 }
  0xa6   :  { %991 = vst [vmem:[%s2478_s2] sm:$0xff] %v806_v14 }
  0xa7   :  { %v818_v15 = vpop.f32.mrf.mxu2 }
  0xa9   :  { %v831_v16 = vpop.f32.mrf.mxu3  ;;  %v794_v19 = vpop.f32.mrf.mxu0 }
  0xaa   :  { %v832_v17 = vadd.f32 %v831_v16, %v818_v15 }
  0xab   :  { %v807_v18 = vpop.f32.mrf.mxu1 }
  0xac   :  { %992 = vst [vmem:[%s2478_s2 + $0x8] sm:$0xff] %v832_v17 }
  0xaf   :  { %v820_v20 = vpop.f32.mrf.mxu2 }
  0xb1   :  { %v833_v8 = vpop.f32.mrf.mxu3 }
  0xc1   :  { %v844_v21 = vpop.f32.mrf.mxu0 }
  0xc3   :  { %v857_v9 = vpop.f32.mrf.mxu1 }
  0xc4   :  { %v858_v22 = vadd.f32 %v857_v9, %v844_v21 }
  0xc6   :  { %993 = vst [vmem:[%s2478_s2 + $0x10] sm:$0xff] %v858_v22 }
  0xc7   :  { %v870_v23 = vpop.f32.mrf.mxu2 }
  0xc9   :  { %v883_v24 = vpop.f32.mrf.mxu3  ;;  %v846_v26 = vpop.f32.mrf.mxu0 }
  0xca   :  { %v884_v25 = vadd.f32 %v883_v24, %v870_v23 }
  0xcb   :  { %v859_v27 = vpop.f32.mrf.mxu1 }
  0xcc   :  { %994 = vst [vmem:[%s2478_s2 + $0x18] sm:$0xff] %v884_v25 }
  0xcf   :  { %v872_v28 = vpop.f32.mrf.mxu2 }
  0xd1   :  { %v885_v29 = vpop.f32.mrf.mxu3 }
  0xe1   :  { %v896_v30 = vpop.f32.mrf.mxu0 }
  0xe3   :  { %v909_v31 = vpop.f32.mrf.mxu1 }
  0xe4   :  { %v910_v32 = vadd.f32 %v909_v31, %v896_v30 }
  0xe6   :  { %995 = vst [vmem:[%s2478_s2 + $0x20] sm:$0xff] %v910_v32 }
  0xe7   :  { %v922_v33 = vpop.f32.mrf.mxu2 }
  0xe9   :  { %v935_v34 = vpop.f32.mrf.mxu3  ;;  %v898_v36 = vpop.f32.mrf.mxu0 }
  0xea   :  { %v936_v35 = vadd.f32 %v935_v34, %v922_v33 }
  0xeb   :  { %v911_v37 = vpop.f32.mrf.mxu1 }
  0xec   :  { %996 = vst [vmem:[%s2478_s2 + $0x28] sm:$0xff] %v936_v35 }
  0xef   :  { %v924_v38 = vpop.f32.mrf.mxu2 }
  0xf1   :  { %v937_v39 = vpop.f32.mrf.mxu3 }
 0x101   :  { %v948_v40 = vpop.f32.mrf.mxu0 }
 0x103   :  { %v961_v41 = vpop.f32.mrf.mxu1 }
 0x104   :  { %v962_v42 = vadd.f32 %v961_v41, %v948_v40 }
 0x106   :  { %997 = vst [vmem:[%s2478_s2 + $0x30] sm:$0xff] %v962_v42 }
 0x107   :  { %v974_v43 = vpop.f32.mrf.mxu2 }
 0x109   :  { %v987_v44 = vpop.f32.mrf.mxu3  ;;  %v950_v45 = vpop.f32.mrf.mxu0 }
 0x10a   :  { %v988_v46 = vadd.f32 %v987_v44, %v974_v43 }
 0x10b   :  { %v963_v47 = vpop.f32.mrf.mxu1 }
 0x10c   :  { %998 = vst [vmem:[%s2478_s2 + $0x38] sm:$0xff] %v988_v46 }
 0x10f   :  { %v976_v48 = vpop.f32.mrf.mxu2 }
 0x111   :  { %v989_v49 = vpop.f32.mrf.mxu3 }

</bundles_post_ra>
